<compile_context>
chip_gen: v5e
topology: v5e:2x2
jax: 0.10.0
libtpu: 0.0.40
codegen_flags: <defaults>
</compile_context>

<pallas_src>
import jax
import jax.numpy as jnp
from jax.experimental import pallas as pl
from jax.experimental.pallas import tpu as pltpu


_CHUNK_THRESHOLD_BYTES = 8 * 1024 * 1024   # below this, one DMA is plenty
_MAX_CHUNKS = 4                            # "a handful" of concurrent DMAs


def _make_identity_kernel(chunks):
    """Build a kernel that copies `chunks` (static (start, size) pairs along
    dim 0) from the input HBM ref to the output HBM ref via async DMA."""

    def kernel(x_hbm, o_hbm, sems):
        copies = []
        # Static Python loop: chunk boundaries are trace-time constants.
        for k, (start, size) in enumerate(chunks):
            cp = pltpu.make_async_copy(
                x_hbm.at[pl.ds(start, size)],
                o_hbm.at[pl.ds(start, size)],
                sems.at[k],
            )
            cp.start()
            copies.append(cp)
        for cp in copies:
            cp.wait()

    return kernel


def identity(x: jax.Array, materialize: bool = True) -> jax.Array:
    """Forward pass of nn.Identity.

    materialize=False returns `x` unchanged (zero HBM traffic — the optimal
    Identity).  materialize=True produces a fresh buffer via a raw HBM→HBM
    DMA copy (no VMEM staging), running at DMA copy bandwidth on v5e/v6e/v7x.
    """
    if not materialize:
        return x
    if x.size == 0:
        return x

    orig_shape = x.shape
    squeeze_back = False
    if x.ndim == 0:
        # Rank-0 edge case: give the DMA a 1-D view, restore at the end.
        x = x.reshape(1)
        squeeze_back = True

    itemsize = jnp.dtype(x.dtype).itemsize
    nbytes = int(x.size) * itemsize
    dim0 = x.shape[0]

    # A handful of concurrent DMAs for large tensors; one DMA otherwise.
    if nbytes >= _CHUNK_THRESHOLD_BYTES and dim0 >= 2:
        num_chunks = min(_MAX_CHUNKS, dim0)
    else:
        num_chunks = 1

    # Static, contiguous partition of dim 0.
    base, rem = divmod(dim0, num_chunks)
    chunks, start = [], 0
    for k in range(num_chunks):
        size = base + (1 if k < rem else 0)
        chunks.append((start, size))
        start += size

    out = pl.pallas_call(
        _make_identity_kernel(chunks),
        out_shape=jax.ShapeDtypeStruct(x.shape, x.dtype),
        in_specs=[pl.BlockSpec(memory_space=pl.ANY)],    # raw HBM ref, no auto-DMA
        out_specs=pl.BlockSpec(memory_space=pl.ANY),     # written only via DMA
        scratch_shapes=[pltpu.SemaphoreType.DMA((num_chunks,))],
        cost_estimate=pl.CostEstimate(
            flops=0,
            transcendentals=0,
            bytes_accessed=2 * nbytes,
        ),
    )(x)

    if squeeze_back:
        out = out.reshape(orig_shape)
    return out


if __name__ == "__main__":
    key = jax.random.PRNGKey(0)
    # Small NCHW-style input consistent with a typical conv-net feature map.
    x = jax.random.normal(key, (2, 4, 16, 16), dtype=jnp.float32)

    y = identity(x)
    jax.block_until_ready(y)

    assert y.shape == x.shape
    assert y.dtype == x.dtype
    assert bool(jnp.all(y == x))

    # Also exercise the zero-copy path (semantically identical).
    y2 = identity(x, materialize=False)
    assert y2 is x

    print("KERNEL_OK")
</pallas_src>

<mosaic_0001>
module attributes {stable_mosaic.version = 11 : i64} {
  func.func @kernel(%arg0: memref<2x4x16x16xf32, #tpu.memory_space<any>>, %arg1: memref<2x4x16x16xf32, #tpu.memory_space<any>>, %arg2: memref<1x!tpu.dma_semaphore, #tpu.memory_space<semaphore_mem>>) attributes {dimension_semantics = [], scalar_prefetch = 0 : i64, scratch_operands = 1 : i64, tpu.core_type = #tpu.core_type<tc>} {
    %c0_i32 = arith.constant 0 : i32
    %c0_i32_0 = arith.constant 0 : i32
    %c0_i32_1 = arith.constant 0 : i32
    %c0_i32_2 = arith.constant 0 : i32
    %c0_i32_3 = arith.constant 0 : i32
    %0 = tpu.memref_slice %arg0[%c0_i32_0, %c0_i32_1, %c0_i32_2, %c0_i32_3] : memref<2x4x16x16xf32, #tpu.memory_space<any>> -> memref<2x4x16x16xf32, #tpu.memory_space<any>>
    %c0_i32_4 = arith.constant 0 : i32
    %c0_i32_5 = arith.constant 0 : i32
    %c0_i32_6 = arith.constant 0 : i32
    %c0_i32_7 = arith.constant 0 : i32
    %1 = tpu.memref_slice %arg1[%c0_i32_4, %c0_i32_5, %c0_i32_6, %c0_i32_7] : memref<2x4x16x16xf32, #tpu.memory_space<any>> -> memref<2x4x16x16xf32, #tpu.memory_space<any>>
    %2 = tpu.memref_slice %arg2[%c0_i32] : memref<1x!tpu.dma_semaphore, #tpu.memory_space<semaphore_mem>> -> memref<1x!tpu.dma_semaphore, #tpu.memory_space<semaphore_mem>>
    %3 = tpu.memref_squeeze %2 : memref<1x!tpu.dma_semaphore, #tpu.memory_space<semaphore_mem>> -> memref<!tpu.dma_semaphore, #tpu.memory_space<semaphore_mem>>
    tpu.enqueue_dma source(%0 : memref<2x4x16x16xf32, #tpu.memory_space<any>>) target(%1 : memref<2x4x16x16xf32, #tpu.memory_space<any>>) target_semaphore(%3 : memref<!tpu.dma_semaphore, #tpu.memory_space<semaphore_mem>>)
    %c0_i32_8 = arith.constant 0 : i32
    %c0_i32_9 = arith.constant 0 : i32
    %c0_i32_10 = arith.constant 0 : i32
    %c0_i32_11 = arith.constant 0 : i32
    %c0_i32_12 = arith.constant 0 : i32
    %4 = tpu.memref_slice %arg0[%c0_i32_9, %c0_i32_10, %c0_i32_11, %c0_i32_12] : memref<2x4x16x16xf32, #tpu.memory_space<any>> -> memref<2x4x16x16xf32, #tpu.memory_space<any>>
    %c0_i32_13 = arith.constant 0 : i32
    %c0_i32_14 = arith.constant 0 : i32
    %c0_i32_15 = arith.constant 0 : i32
    %c0_i32_16 = arith.constant 0 : i32
    %5 = tpu.memref_slice %arg1[%c0_i32_13, %c0_i32_14, %c0_i32_15, %c0_i32_16] : memref<2x4x16x16xf32, #tpu.memory_space<any>> -> memref<2x4x16x16xf32, #tpu.memory_space<any>>
    %6 = tpu.memref_slice %arg2[%c0_i32_8] : memref<1x!tpu.dma_semaphore, #tpu.memory_space<semaphore_mem>> -> memref<1x!tpu.dma_semaphore, #tpu.memory_space<semaphore_mem>>
    %7 = tpu.memref_squeeze %6 : memref<1x!tpu.dma_semaphore, #tpu.memory_space<semaphore_mem>> -> memref<!tpu.dma_semaphore, #tpu.memory_space<semaphore_mem>>
    tpu.wait_dma2 semaphore(%7 : memref<!tpu.dma_semaphore, #tpu.memory_space<semaphore_mem>>) src(%4 : memref<2x4x16x16xf32, #tpu.memory_space<any>>) dst(%5 : memref<2x4x16x16xf32, #tpu.memory_space<any>>)
    return
  }
}

</mosaic_0001>

<bundles_post_ra>
// kernel: tpu_custom_call.1
= control target key start
LH: loop header
LB: loop body
LE: loop exit
PB: predicated region body
PF: predicated region fallthrough
CT: control target
= control target key end

     0   :  { %s34_s12 = smov [#allocation2]   ;;  %s35_s13 = smov [#allocation3]   ;;  %s53_s0 = inlined_call_operand.hbm [shape: f32[2,4,16,16], index: 0, kind: input, shape index: {}]   ;;  %s54_s1 = inlined_call_operand.hbm [shape: f32[2,4,16,16], index: 1, kind: output, shape index: {}]  }
   0x1   :  { %s10_s8 = sshll.u32 %s53_s0, 4  ;;  %s12_s11 = sshll.u32 %s54_s1, 4  ;;  %s11_s8 = int_to_ptr.hbm [resolvable:$true] %s10_s8  ;;  %s13_s11 = int_to_ptr.hbm [resolvable:$true] %s12_s11 }
   0x2   :  { %s36_s14 = smov 0  }
   0x3   :  { %16 = dma.general %s11_s8, 2048, %s13_s11, %s34_s12, %s35_s13, [#allocation4], %s36_s14, 0  }
   0x4   :  { %32 = dma.done.wait [#allocation2], 2048 }
   0x5   :  { %33 = vsyncadd [#allocation2], 4294965248 }
   0x6   :  { %22 = vsyncmov [#allocation2] }
   0x9   :  { %s23_s15 = vpop.sfrf %22 }
   0xa   :  { %p28_p0 = scmp.ne.s32.totalorder %s23_s15, 0 }
   0xc   :  { %27 = shalt.err (%p28_p0)  }

</bundles_post_ra>
